<compile_context>
chip_gen: v7x
topology: tpu7x:2x2x1
jax: 0.10.0
libtpu: 0.0.40
codegen_flags: <defaults>
</compile_context>

<pallas_src>
import math
from functools import partial

import jax
import jax.numpy as jnp
from jax.experimental import pallas as pl
from jax.experimental.pallas import tpu as pltpu


# -----------------------------------------------------------------------------
# Kernel 1: Q/K/V projections -> head-major (h, N, d_k) outputs.
# -----------------------------------------------------------------------------
def qkv_proj_kernel(xq_ref, xk_ref, xv_ref,
                    wq_ref, bq_ref, wk_ref, bk_ref, wv_ref, bv_ref,
                    q_ref, k_ref, v_ref, *, h, d_k):
    def project(x_ref, w_ref, b_ref, out_ref):
        y = jnp.dot(x_ref[...], w_ref[...], preferred_element_type=jnp.float32)
        y = y + b_ref[...]
        # Head split happens once per row tile (static lane slices), so the
        # attention kernel never needs an XLA transpose or per-step slicing.
        for hh in range(h):
            out_ref[hh] = y[:, hh * d_k:(hh + 1) * d_k].astype(out_ref.dtype)

    project(xq_ref, wq_ref, bq_ref, q_ref)
    project(xk_ref, wk_ref, bk_ref, k_ref)
    project(xv_ref, wv_ref, bv_ref, v_ref)


# -----------------------------------------------------------------------------
# Kernel 2: flash attention on head-major inputs, lane-dense (tq, D) output.
#   grid = (B, S//tq, S//tk); kv axis is the reduction ("arbitrary") axis.
# -----------------------------------------------------------------------------
def flash_attn_kernel(q_ref, k_ref, v_ref, o_ref, m_scr, l_scr, acc_scr, *, h):
    ki = pl.program_id(2)

    @pl.when(ki == 0)
    def _():
        m_scr[...] = jnp.full_like(m_scr, -jnp.inf)
        l_scr[...] = jnp.zeros_like(l_scr)
        acc_scr[...] = jnp.zeros_like(acc_scr)

    # MXU-native dtype for the two matmuls; stats / accumulator stay in f32.
    mm_dtype = jnp.bfloat16 if q_ref.dtype == jnp.float32 else q_ref.dtype
    q = q_ref[...].astype(mm_dtype)   # (h, tq, d_k), pre-scaled by 1/sqrt(d_k)
    k = k_ref[...].astype(mm_dtype)   # (h, tk, d_k)
    v = v_ref[...].astype(mm_dtype)   # (h, tk, d_k)

    # Heads batched; contraction over d_k of both operands (no explicit K^T).
    s = jnp.einsum('hqd,hkd->hqk', q, k,
                   preferred_element_type=jnp.float32)           # (h, tq, tk)

    m_prev = m_scr[...]                                          # (h, tq, 1)
    m_new = jnp.maximum(m_prev, jnp.max(s, axis=-1, keepdims=True))
    alpha = jnp.exp(m_prev - m_new)
    p = jnp.exp(s - m_new)                                       # f32 stats
    l_scr[...] = alpha * l_scr[...] + jnp.sum(p, axis=-1, keepdims=True)
    pv = jnp.einsum('hqk,hkd->hqd', p.astype(mm_dtype), v,
                    preferred_element_type=jnp.float32)          # (h, tq, d_k)
    acc_scr[...] = alpha * acc_scr[...] + pv
    m_scr[...] = m_new

    @pl.when(ki == pl.num_programs(2) - 1)
    def _():
        inv_l = pl.reciprocal(l_scr[...], approx=False)  # exact; once per q tile
        ctx = acc_scr[...] * inv_l                       # (h, tq, d_k) f32
        # In-kernel head merge -> one lane-dense (tq, h*d_k) store
        # (no masked d_k-wide stores, no XLA merge transpose afterwards).
        merged = jnp.concatenate([ctx[hh] for hh in range(h)], axis=-1)
        o_ref[...] = merged.astype(o_ref.dtype)


# -----------------------------------------------------------------------------
# Kernel 3: output projection (row-tiled x @ W + b, lane-dense D output).
# -----------------------------------------------------------------------------
def linear_kernel(x_ref, w_ref, b_ref, o_ref):
    y = jnp.dot(x_ref[...], w_ref[...], preferred_element_type=jnp.float32)
    o_ref[...] = (y + b_ref[...]).astype(o_ref.dtype)


# -----------------------------------------------------------------------------
# Tiling / VMEM helpers.
# -----------------------------------------------------------------------------
def _row_tile(n, cap=512):
    # 512-row tiles amortize the ~0.35us per-grid-step overhead (v5e/v6e).
    if n <= cap:
        return n
    for t in (512, 256, 128, 64, 32, 16, 8):
        if t <= cap and n % t == 0:
            return t
    return 256  # rows are independent; ragged last block is safely padded


def _seq_tile(n, cap=256):
    if n <= cap:
        return n
    for t in (256, 128, 64, 32, 16, 8):
        if t <= cap and n % t == 0:
            return t
    # TODO(synk): no kv masking path -- fall back to the full sequence.
    return n


def _vmem_limit(estimate_bytes):
    # 1.5x headroom over the static estimate, floored at 16 MiB, capped at
    # 64 MiB so the same number stays legal on v7x (64 MiB physical VMEM).
    want = int(estimate_bytes * 1.5) + (2 << 20)
    return max(16 << 20, min(want, 64 << 20))


# -----------------------------------------------------------------------------
# Wrapper: full MultiHeadedAttention forward (eval mode, mask=None).
# -----------------------------------------------------------------------------
def multi_headed_attention(query, key, value, params, *, h):
    B, S, D = query.shape
    assert D % h == 0
    d_k = D // h
    wq, bq, wk, bk, wv, bv, wo, bo = params
    dtype = query.dtype
    isz = jnp.dtype(dtype).itemsize
    N = B * S

    # Fold the 1/sqrt(d_k) score scale into the Q projection weights/bias
    # (weights-side, outside the hot loop) -- no in-kernel scale multiply.
    scale = 1.0 / math.sqrt(d_k)
    wq_s, bq_s = wq * scale, (bq * scale).reshape(1, D)
    bk2, bv2, bo2 = bk.reshape(1, D), bv.reshape(1, D), bo.reshape(1, D)

    tm = _row_tile(N)
    row_spec = pl.BlockSpec((tm, D), lambda i: (i, 0))
    # Grid-invariant weight/bias blocks: single-buffered (constant index_map,
    # nothing to double-buffer) -- halves resident weight VMEM.
    w_spec = pl.BlockSpec((D, D), lambda i: (0, 0), pipeline_mode=pl.Buffered(1))
    b_spec = pl.BlockSpec((1, D), lambda i: (0, 0), pipeline_mode=pl.Buffered(1))
    head_out_spec = pl.BlockSpec((h, tm, d_k), lambda i: (0, i, 0))

    # ---- 1) Q/K/V projections -> head-major (h, N, d_k) ---------------------
    qkv_vmem = (12 * tm * D + 3 * D * D + 3 * D) * isz + 6 * tm * D * 4
    q_hm, k_hm, v_hm = pl.pallas_call(
        partial(qkv_proj_kernel, h=h, d_k=d_k),
        out_shape=[jax.ShapeDtypeStruct((h, N, d_k), dtype)] * 3,
        grid_spec=pltpu.PrefetchScalarGridSpec(
            num_scalar_prefetch=0,
            grid=(pl.cdiv(N, tm),),
            in_specs=[row_spec, row_spec, row_spec,
                      w_spec, b_spec, w_spec, b_spec, w_spec, b_spec],
            out_specs=[head_out_spec] * 3,
        ),
        compiler_params=pltpu.CompilerParams(
            dimension_semantics=("parallel",),
            vmem_limit_bytes=_vmem_limit(qkv_vmem)),
        cost_estimate=pl.CostEstimate(
            flops=6 * N * D * D, transcendentals=0,
            bytes_accessed=(6 * N * D + 3 * D * D + 3 * D) * isz),
    )(query.reshape(N, D), key.reshape(N, D), value.reshape(N, D),
      wq_s, bq_s, wk, bk2, wv, bv2)

    # ---- 2) flash attention -> lane-dense (N, D) context --------------------
    tq = _seq_tile(S)
    tk = _seq_tile(S)
    # v7x has 2 TensorCores; keep the parallel grid extent >= 2 when possible.
    if B * (S // tq) < 2 and tq % 16 == 0:
        tq //= 2
    qpb, kpb = S // tq, S // tk

    q_spec = pl.BlockSpec((h, tq, d_k), lambda b, qi, ki: (0, b * qpb + qi, 0))
    kv_spec = pl.BlockSpec((h, tk, d_k), lambda b, qi, ki: (0, b * kpb + ki, 0))
    o_spec = pl.BlockSpec((tq, D), lambda b, qi, ki: (b * qpb + qi, 0))

    attn_vmem = ((2 * tq * D + 4 * tk * D + 2 * tq * D) * isz
                 + (2 * 128 + d_k) * h * tq * 4          # m/l (lane-padded), acc
                 + 3 * h * tq * tk * 4)                  # s / p f32 temporaries
    ctx2d = pl.pallas_call(
        partial(flash_attn_kernel, h=h),
        out_shape=jax.ShapeDtypeStruct((N, D), dtype),
        grid_spec=pltpu.PrefetchScalarGridSpec(
            num_scalar_prefetch=0,
            grid=(B, qpb, kpb),
            in_specs=[q_spec, kv_spec, kv_spec],
            out_specs=o_spec,
            scratch_shapes=[pltpu.VMEM((h, tq, 1), jnp.float32),     # m
                            pltpu.VMEM((h, tq, 1), jnp.float32),     # l
                            pltpu.VMEM((h, tq, d_k), jnp.float32)],  # acc
        ),
        compiler_params=pltpu.CompilerParams(
            dimension_semantics=("parallel", "parallel", "arbitrary"),
            vmem_limit_bytes=_vmem_limit(attn_vmem)),
        cost_estimate=pl.CostEstimate(
            flops=4 * B * S * S * D, transcendentals=2 * B * h * S * S,
            bytes_accessed=4 * N * D * isz),
    )(q_hm, k_hm, v_hm)

    # ---- 3) output projection (context is already lane-dense (N, D)) --------
    lin_vmem = (4 * tm * D + D * D + D) * isz + 2 * tm * D * 4
    out2d = pl.pallas_call(
        linear_kernel,
        out_shape=jax.ShapeDtypeStruct((N, D), dtype),
        grid_spec=pltpu.PrefetchScalarGridSpec(
            num_scalar_prefetch=0,
            grid=(pl.cdiv(N, tm),),
            in_specs=[row_spec, w_spec, b_spec],
            out_specs=row_spec,
        ),
        compiler_params=pltpu.CompilerParams(
            dimension_semantics=("parallel",),
            vmem_limit_bytes=_vmem_limit(lin_vmem)),
        cost_estimate=pl.CostEstimate(
            flops=2 * N * D * D, transcendentals=0,
            bytes_accessed=(2 * N * D + D * D + D) * isz),
    )(ctx2d, wo, bo2)

    return out2d.reshape(B, S, D)


# -----------------------------------------------------------------------------
# Pure-JAX reference matching the PyTorch forward (mask=None, eval mode).
# -----------------------------------------------------------------------------
def mha_reference(query, key, value, params, *, h):
    B, S, D = query.shape
    d_k = D // h
    wq, bq, wk, bk, wv, bv, wo, bo = params

    def proj(x, w, b):
        y = x @ w + b
        return y.reshape(B, S, h, d_k).transpose(0, 2, 1, 3)   # (B, h, S, d_k)

    Q, K, V = proj(query, wq, bq), proj(key, wk, bk), proj(value, wv, bv)
    scores = jnp.einsum("bhqd,bhkd->bhqk", Q, K) / math.sqrt(d_k)
    p = jax.nn.softmax(scores, axis=-1)
    ctx = jnp.einsum("bhqk,bhkd->bhqd", p, V)
    ctx = ctx.transpose(0, 2, 1, 3).reshape(B, S, D)
    return ctx @ wo + bo


if __name__ == "__main__":
    B, S, D, H = 2, 8, 32, 4

    key0 = jax.random.PRNGKey(0)
    keys = jax.random.split(key0, 12)

    query = jax.random.normal(keys[0], (B, S, D), dtype=jnp.float32)
    key_in = jax.random.normal(keys[1], (B, S, D), dtype=jnp.float32)
    value = jax.random.normal(keys[2], (B, S, D), dtype=jnp.float32)

    def init_linear(kw, kb):
        w = 0.05 * jax.random.normal(kw, (D, D), dtype=jnp.float32)
        b = 0.01 * jax.random.normal(kb, (D,), dtype=jnp.float32)
        return w, b

    wq, bq = init_linear(keys[3], keys[4])
    wk, bk = init_linear(keys[5], keys[6])
    wv, bv = init_linear(keys[7], keys[8])
    wo, bo = init_linear(keys[9], keys[10])
    params = (wq, bq, wk, bk, wv, bv, wo, bo)

    out = multi_headed_attention(query, key_in, value, params, h=H)
    out = jax.block_until_ready(out)

    ref = mha_reference(query, key_in, value, params, h=H)
    assert out.shape == (B, S, D)
    # Tolerance covers the bf16 MXU matmuls inside the attention kernel
    # (projections, accumulation and softmax stats stay f32; reciprocal exact).
    err = jnp.max(jnp.abs(out - ref))
    assert jnp.allclose(out, ref, atol=5e-3, rtol=5e-3), f"max abs err = {err}"

    print("KERNEL_OK")
</pallas_src>

<mosaic_0001>
module attributes {stable_mosaic.version = 11 : i64} {
  func.func @qkv_proj_kernel(%arg0: i32, %arg1: memref<16x32xf32, #tpu.memory_space<vmem>>, %arg2: memref<16x32xf32, #tpu.memory_space<vmem>>, %arg3: memref<16x32xf32, #tpu.memory_space<vmem>>, %arg4: memref<32x32xf32, #tpu.memory_space<vmem>>, %arg5: memref<1x32xf32, #tpu.memory_space<vmem>>, %arg6: memref<32x32xf32, #tpu.memory_space<vmem>>, %arg7: memref<1x32xf32, #tpu.memory_space<vmem>>, %arg8: memref<32x32xf32, #tpu.memory_space<vmem>>, %arg9: memref<1x32xf32, #tpu.memory_space<vmem>>, %arg10: memref<4x16x8xf32, #tpu.memory_space<vmem>>, %arg11: memref<4x16x8xf32, #tpu.memory_space<vmem>>, %arg12: memref<4x16x8xf32, #tpu.memory_space<vmem>>) attributes {dimension_semantics = [#tpu.dimension_semantics<parallel>], iteration_bounds = array<i64: 1>, scalar_prefetch = 0 : i64, scratch_operands = 0 : i64, tpu.core_type = #tpu.core_type<tc>, window_params = [{transform_indices = @transform_0, window_bounds = array<i64: 16, 32>}, {transform_indices = @transform_1, window_bounds = array<i64: 16, 32>}, {transform_indices = @transform_2, window_bounds = array<i64: 16, 32>}, {pipeline_mode = #tpu.pipeline_mode<synchronous>, transform_indices = @transform_3, window_bounds = array<i64: 32, 32>}, {pipeline_mode = #tpu.pipeline_mode<synchronous>, transform_indices = @transform_4, window_bounds = array<i64: 1, 32>}, {pipeline_mode = #tpu.pipeline_mode<synchronous>, transform_indices = @transform_5, window_bounds = array<i64: 32, 32>}, {pipeline_mode = #tpu.pipeline_mode<synchronous>, transform_indices = @transform_6, window_bounds = array<i64: 1, 32>}, {pipeline_mode = #tpu.pipeline_mode<synchronous>, transform_indices = @transform_7, window_bounds = array<i64: 32, 32>}, {pipeline_mode = #tpu.pipeline_mode<synchronous>, transform_indices = @transform_8, window_bounds = array<i64: 1, 32>}, {transform_indices = @transform_9, window_bounds = array<i64: 4, 16, 8>}, {transform_indices = @transform_10, window_bounds = array<i64: 4, 16, 8>}, {transform_indices = @transform_11, window_bounds = array<i64: 4, 16, 8>}]} {
    %c0 = arith.constant 0 : index
    %c0_0 = arith.constant 0 : index
    %0 = vector.load %arg1[%c0, %c0_0] : memref<16x32xf32, #tpu.memory_space<vmem>>, vector<16x32xf32>
    %c0_1 = arith.constant 0 : index
    %c0_2 = arith.constant 0 : index
    %1 = vector.load %arg4[%c0_1, %c0_2] : memref<32x32xf32, #tpu.memory_space<vmem>>, vector<32x32xf32>
    %cst = arith.constant dense<0.000000e+00> : vector<16x32xf32>
    %2 = tpu.matmul %0, %1, %cst {dimension_numbers = #tpu.dot_dimension_numbers<[1], [0], [0], [1], [0, 0, 1, 1], [], []>} : vector<16x32xf32>, vector<32x32xf32>, vector<16x32xf32> -> vector<16x32xf32>
    %c0_3 = arith.constant 0 : index
    %c0_4 = arith.constant 0 : index
    %3 = vector.load %arg5[%c0_3, %c0_4] : memref<1x32xf32, #tpu.memory_space<vmem>>, vector<1x32xf32>
    %4 = vector.broadcast %3 : vector<1x32xf32> to vector<16x32xf32>
    %5 = arith.addf %2, %4 : vector<16x32xf32>
    %6 = vector.extract_strided_slice %5 {offsets = [0, 0], sizes = [16, 8], strides = [1, 1]} : vector<16x32xf32> to vector<16x8xf32>
    %c0_5 = arith.constant 0 : index
    %c0_6 = arith.constant 0 : index
    %c0_7 = arith.constant 0 : index
    %7 = vector.load %arg10[%c0_5, %c0_6, %c0_7] : memref<4x16x8xf32, #tpu.memory_space<vmem>>, vector<1x16x8xf32>
    %8 = vector.shape_cast %7 : vector<1x16x8xf32> to vector<16x8xf32>
    %9 = vector.shape_cast %6 : vector<16x8xf32> to vector<1x16x8xf32>
    tpu.vector_store %arg10[%c0_5, %c0_6, %c0_7], %9 {strides = array<i32>} : memref<4x16x8xf32, #tpu.memory_space<vmem>>, vector<1x16x8xf32>,
    %10 = vector.extract_strided_slice %5 {offsets = [0, 8], sizes = [16, 8], strides = [1, 1]} : vector<16x32xf32> to vector<16x8xf32>
    %c1 = arith.constant 1 : index
    %c0_8 = arith.constant 0 : index
    %c0_9 = arith.constant 0 : index
    %11 = vector.load %arg10[%c1, %c0_8, %c0_9] : memref<4x16x8xf32, #tpu.memory_space<vmem>>, vector<1x16x8xf32>
    %12 = vector.shape_cast %11 : vector<1x16x8xf32> to vector<16x8xf32>
    %13 = vector.shape_cast %10 : vector<16x8xf32> to vector<1x16x8xf32>
    tpu.vector_store %arg10[%c1, %c0_8, %c0_9], %13 {strides = array<i32>} : memref<4x16x8xf32, #tpu.memory_space<vmem>>, vector<1x16x8xf32>,
    %14 = vector.extract_strided_slice %5 {offsets = [0, 16], sizes = [16, 8], strides = [1, 1]} : vector<16x32xf32> to vector<16x8xf32>
    %c2 = arith.constant 2 : index
    %c0_10 = arith.constant 0 : index
    %c0_11 = arith.constant 0 : index
    %15 = vector.load %arg10[%c2, %c0_10, %c0_11] : memref<4x16x8xf32, #tpu.memory_space<vmem>>, vector<1x16x8xf32>
    %16 = vector.shape_cast %15 : vector<1x16x8xf32> to vector<16x8xf32>
    %17 = vector.shape_cast %14 : vector<16x8xf32> to vector<1x16x8xf32>
    tpu.vector_store %arg10[%c2, %c0_10, %c0_11], %17 {strides = array<i32>} : memref<4x16x8xf32, #tpu.memory_space<vmem>>, vector<1x16x8xf32>,
    %18 = vector.extract_strided_slice %5 {offsets = [0, 24], sizes = [16, 8], strides = [1, 1]} : vector<16x32xf32> to vector<16x8xf32>
    %c3 = arith.constant 3 : index
    %c0_12 = arith.constant 0 : index
    %c0_13 = arith.constant 0 : index
    %19 = vector.load %arg10[%c3, %c0_12, %c0_13] : memref<4x16x8xf32, #tpu.memory_space<vmem>>, vector<1x16x8xf32>
    %20 = vector.shape_cast %19 : vector<1x16x8xf32> to vector<16x8xf32>
    %21 = vector.shape_cast %18 : vector<16x8xf32> to vector<1x16x8xf32>
    tpu.vector_store %arg10[%c3, %c0_12, %c0_13], %21 {strides = array<i32>} : memref<4x16x8xf32, #tpu.memory_space<vmem>>, vector<1x16x8xf32>,
    %c0_14 = arith.constant 0 : index
    %c0_15 = arith.constant 0 : index
    %22 = vector.load %arg2[%c0_14, %c0_15] : memref<16x32xf32, #tpu.memory_space<vmem>>, vector<16x32xf32>
    %c0_16 = arith.constant 0 : index
    %c0_17 = arith.constant 0 : index
    %23 = vector.load %arg6[%c0_16, %c0_17] : memref<32x32xf32, #tpu.memory_space<vmem>>, vector<32x32xf32>
    %cst_18 = arith.constant dense<0.000000e+00> : vector<16x32xf32>
    %24 = tpu.matmul %22, %23, %cst_18 {dimension_numbers = #tpu.dot_dimension_numbers<[1], [0], [0], [1], [0, 0, 1, 1], [], []>} : vector<16x32xf32>, vector<32x32xf32>, vector<16x32xf32> -> vector<16x32xf32>
    %c0_19 = arith.constant 0 : index
    %c0_20 = arith.constant 0 : index
    %25 = vector.load %arg7[%c0_19, %c0_20] : memref<1x32xf32, #tpu.memory_space<vmem>>, vector<1x32xf32>
    %26 = vector.broadcast %25 : vector<1x32xf32> to vector<16x32xf32>
    %27 = arith.addf %24, %26 : vector<16x32xf32>
    %28 = vector.extract_strided_slice %27 {offsets = [0, 0], sizes = [16, 8], strides = [1, 1]} : vector<16x32xf32> to vector<16x8xf32>
    %c0_21 = arith.constant 0 : index
    %c0_22 = arith.constant 0 : index
    %c0_23 = arith.constant 0 : index
    %29 = vector.load %arg11[%c0_21, %c0_22, %c0_23] : memref<4x16x8xf32, #tpu.memory_space<vmem>>, vector<1x16x8xf32>
    %30 = vector.shape_cast %29 : vector<1x16x8xf32> to vector<16x8xf32>
    %31 = vector.shape_cast %28 : vector<16x8xf32> to vector<1x16x8xf32>
    tpu.vector_store %arg11[%c0_21, %c0_22, %c0_23], %31 {strides = array<i32>} : memref<4x16x8xf32, #tpu.memory_space<vmem>>, vector<1x16x8xf32>,
    %32 = vector.extract_strided_slice %27 {offsets = [0, 8], sizes = [16, 8], strides = [1, 1]} : vector<16x32xf32> to vector<16x8xf32>
    %c1_24 = arith.constant 1 : index
    %c0_25 = arith.constant 0 : index
    %c0_26 = arith.constant 0 : index
    %33 = vector.load %arg11[%c1_24, %c0_25, %c0_26] : memref<4x16x8xf32, #tpu.memory_space<vmem>>, vector<1x16x8xf32>
    %34 = vector.shape_cast %33 : vector<1x16x8xf32> to vector<16x8xf32>
    %35 = vector.shape_cast %32 : vector<16x8xf32> to vector<1x16x8xf32>
    tpu.vector_store %arg11[%c1_24, %c0_25, %c0_26], %35 {strides = array<i32>} : memref<4x16x8xf32, #tpu.memory_space<vmem>>, vector<1x16x8xf32>,
    %36 = vector.extract_strided_slice %27 {offsets = [0, 16], sizes = [16, 8], strides = [1, 1]} : vector<16x32xf32> to vector<16x8xf32>
    %c2_27 = arith.constant 2 : index
    %c0_28 = arith.constant 0 : index
    %c0_29 = arith.constant 0 : index
    %37 = vector.load %arg11[%c2_27, %c0_28, %c0_29] : memref<4x16x8xf32, #tpu.memory_space<vmem>>, vector<1x16x8xf32>
    %38 = vector.shape_cast %37 : vector<1x16x8xf32> to vector<16x8xf32>
    %39 = vector.shape_cast %36 : vector<16x8xf32> to vector<1x16x8xf32>
    tpu.vector_store %arg11[%c2_27, %c0_28, %c0_29], %39 {strides = array<i32>} : memref<4x16x8xf32, #tpu.memory_space<vmem>>, vector<1x16x8xf32>,
    %40 = vector.extract_strided_slice %27 {offsets = [0, 24], sizes = [16, 8], strides = [1, 1]} : vector<16x32xf32> to vector<16x8xf32>
    %c3_30 = arith.constant 3 : index
    %c0_31 = arith.constant 0 : index
    %c0_32 = arith.constant 0 : index
    %41 = vector.load %arg11[%c3_30, %c0_31, %c0_32] : memref<4x16x8xf32, #tpu.memory_space<vmem>>, vector<1x16x8xf32>
    %42 = vector.shape_cast %41 : vector<1x16x8xf32> to vector<16x8xf32>
    %43 = vector.shape_cast %40 : vector<16x8xf32> to vector<1x16x8xf32>
    tpu.vector_store %arg11[%c3_30, %c0_31, %c0_32], %43 {strides = array<i32>} : memref<4x16x8xf32, #tpu.memory_space<vmem>>, vector<1x16x8xf32>,
    %c0_33 = arith.constant 0 : index
    %c0_34 = arith.constant 0 : index
    %44 = vector.load %arg3[%c0_33, %c0_34] : memref<16x32xf32, #tpu.memory_space<vmem>>, vector<16x32xf32>
    %c0_35 = arith.constant 0 : index
    %c0_36 = arith.constant 0 : index
    %45 = vector.load %arg8[%c0_35, %c0_36] : memref<32x32xf32, #tpu.memory_space<vmem>>, vector<32x32xf32>
    %cst_37 = arith.constant dense<0.000000e+00> : vector<16x32xf32>
    %46 = tpu.matmul %44, %45, %cst_37 {dimension_numbers = #tpu.dot_dimension_numbers<[1], [0], [0], [1], [0, 0, 1, 1], [], []>} : vector<16x32xf32>, vector<32x32xf32>, vector<16x32xf32> -> vector<16x32xf32>
    %c0_38 = arith.constant 0 : index
    %c0_39 = arith.constant 0 : index
    %47 = vector.load %arg9[%c0_38, %c0_39] : memref<1x32xf32, #tpu.memory_space<vmem>>, vector<1x32xf32>
    %48 = vector.broadcast %47 : vector<1x32xf32> to vector<16x32xf32>
    %49 = arith.addf %46, %48 : vector<16x32xf32>
    %50 = vector.extract_strided_slice %49 {offsets = [0, 0], sizes = [16, 8], strides = [1, 1]} : vector<16x32xf32> to vector<16x8xf32>
    %c0_40 = arith.constant 0 : index
    %c0_41 = arith.constant 0 : index
    %c0_42 = arith.constant 0 : index
    %51 = vector.load %arg12[%c0_40, %c0_41, %c0_42] : memref<4x16x8xf32, #tpu.memory_space<vmem>>, vector<1x16x8xf32>
    %52 = vector.shape_cast %51 : vector<1x16x8xf32> to vector<16x8xf32>
    %53 = vector.shape_cast %50 : vector<16x8xf32> to vector<1x16x8xf32>
    tpu.vector_store %arg12[%c0_40, %c0_41, %c0_42], %53 {strides = array<i32>} : memref<4x16x8xf32, #tpu.memory_space<vmem>>, vector<1x16x8xf32>,
    %54 = vector.extract_strided_slice %49 {offsets = [0, 8], sizes = [16, 8], strides = [1, 1]} : vector<16x32xf32> to vector<16x8xf32>
    %c1_43 = arith.constant 1 : index
    %c0_44 = arith.constant 0 : index
    %c0_45 = arith.constant 0 : index
    %55 = vector.load %arg12[%c1_43, %c0_44, %c0_45] : memref<4x16x8xf32, #tpu.memory_space<vmem>>, vector<1x16x8xf32>
    %56 = vector.shape_cast %55 : vector<1x16x8xf32> to vector<16x8xf32>
    %57 = vector.shape_cast %54 : vector<16x8xf32> to vector<1x16x8xf32>
    tpu.vector_store %arg12[%c1_43, %c0_44, %c0_45], %57 {strides = array<i32>} : memref<4x16x8xf32, #tpu.memory_space<vmem>>, vector<1x16x8xf32>,
    %58 = vector.extract_strided_slice %49 {offsets = [0, 16], sizes = [16, 8], strides = [1, 1]} : vector<16x32xf32> to vector<16x8xf32>
    %c2_46 = arith.constant 2 : index
    %c0_47 = arith.constant 0 : index
    %c0_48 = arith.constant 0 : index
    %59 = vector.load %arg12[%c2_46, %c0_47, %c0_48] : memref<4x16x8xf32, #tpu.memory_space<vmem>>, vector<1x16x8xf32>
    %60 = vector.shape_cast %59 : vector<1x16x8xf32> to vector<16x8xf32>
    %61 = vector.shape_cast %58 : vector<16x8xf32> to vector<1x16x8xf32>
    tpu.vector_store %arg12[%c2_46, %c0_47, %c0_48], %61 {strides = array<i32>} : memref<4x16x8xf32, #tpu.memory_space<vmem>>, vector<1x16x8xf32>,
    %62 = vector.extract_strided_slice %49 {offsets = [0, 24], sizes = [16, 8], strides = [1, 1]} : vector<16x32xf32> to vector<16x8xf32>
    %c3_49 = arith.constant 3 : index
    %c0_50 = arith.constant 0 : index
    %c0_51 = arith.constant 0 : index
    %63 = vector.load %arg12[%c3_49, %c0_50, %c0_51] : memref<4x16x8xf32, #tpu.memory_space<vmem>>, vector<1x16x8xf32>
    %64 = vector.shape_cast %63 : vector<1x16x8xf32> to vector<16x8xf32>
    %65 = vector.shape_cast %62 : vector<16x8xf32> to vector<1x16x8xf32>
    tpu.vector_store %arg12[%c3_49, %c0_50, %c0_51], %65 {strides = array<i32>} : memref<4x16x8xf32, #tpu.memory_space<vmem>>, vector<1x16x8xf32>,
    return
  }
  func.func @transform_0(%arg0: i32) -> (i32, i32) {
    %c0_i32 = arith.constant 0 : i32
    %c0_i32_0 = arith.constant 0 : i32
    return %arg0, %c0_i32 : i32, i32
  }
  func.func @transform_1(%arg0: i32) -> (i32, i32) {
    %c0_i32 = arith.constant 0 : i32
    %c0_i32_0 = arith.constant 0 : i32
    return %arg0, %c0_i32 : i32, i32
  }
  func.func @transform_2(%arg0: i32) -> (i32, i32) {
    %c0_i32 = arith.constant 0 : i32
    %c0_i32_0 = arith.constant 0 : i32
    return %arg0, %c0_i32 : i32, i32
  }
  func.func @transform_3(%arg0: i32) -> (i32, i32) {
    %c0_i32 = arith.constant 0 : i32
    %c0_i32_0 = arith.constant 0 : i32
    %c0_i32_1 = arith.constant 0 : i32
    return %c0_i32, %c0_i32_0 : i32, i32
  }
  func.func @transform_4(%arg0: i32) -> (i32, i32) {
    %c0_i32 = arith.constant 0 : i32
    %c0_i32_0 = arith.constant 0 : i32
    %c0_i32_1 = arith.constant 0 : i32
    return %c0_i32, %c0_i32_0 : i32, i32
  }
  func.func @transform_5(%arg0: i32) -> (i32, i32) {
    %c0_i32 = arith.constant 0 : i32
    %c0_i32_0 = arith.constant 0 : i32
    %c0_i32_1 = arith.constant 0 : i32
    return %c0_i32, %c0_i32_0 : i32, i32
  }
  func.func @transform_6(%arg0: i32) -> (i32, i32) {
    %c0_i32 = arith.constant 0 : i32
    %c0_i32_0 = arith.constant 0 : i32
    %c0_i32_1 = arith.constant 0 : i32
    return %c0_i32, %c0_i32_0 : i32, i32
  }
  func.func @transform_7(%arg0: i32) -> (i32, i32) {
    %c0_i32 = arith.constant 0 : i32
    %c0_i32_0 = arith.constant 0 : i32
    %c0_i32_1 = arith.constant 0 : i32
    return %c0_i32, %c0_i32_0 : i32, i32
  }
  func.func @transform_8(%arg0: i32) -> (i32, i32) {
    %c0_i32 = arith.constant 0 : i32
    %c0_i32_0 = arith.constant 0 : i32
    %c0_i32_1 = arith.constant 0 : i32
    return %c0_i32, %c0_i32_0 : i32, i32
  }
  func.func @transform_9(%arg0: i32) -> (i32, i32, i32) {
    %c0_i32 = arith.constant 0 : i32
    %c0_i32_0 = arith.constant 0 : i32
    %c0_i32_1 = arith.constant 0 : i32
    return %c0_i32, %arg0, %c0_i32_0 : i32, i32, i32
  }
  func.func @transform_10(%arg0: i32) -> (i32, i32, i32) {
    %c0_i32 = arith.constant 0 : i32
    %c0_i32_0 = arith.constant 0 : i32
    %c0_i32_1 = arith.constant 0 : i32
    return %c0_i32, %arg0, %c0_i32_0 : i32, i32, i32
  }
  func.func @transform_11(%arg0: i32) -> (i32, i32, i32) {
    %c0_i32 = arith.constant 0 : i32
    %c0_i32_0 = arith.constant 0 : i32
    %c0_i32_1 = arith.constant 0 : i32
    return %c0_i32, %arg0, %c0_i32_0 : i32, i32, i32
  }
}

</mosaic_0001>

<bundles_post_ra>
// kernel: tpu_custom_call.1
= control target key start
LH: loop header
LB: loop body
LE: loop exit
PB: predicated region body
PF: predicated region fallthrough
CT: control target
= control target key end

     0   :  { %17 = vsyncpa [#allocation3], 0  ;;  %s1062_s0 = inlined_call_operand.hbm [shape: f32[16,32], index: 0, kind: input, shape index: {}]   ;;  %s1063_s1 = inlined_call_operand.hbm [shape: f32[16,32], index: 1, kind: input, shape index: {}]   ;;  %s1064_s2 = inlined_call_operand.hbm [shape: f32[16,32], index: 2, kind: input, shape index: {}]   ;;  %s1065_s3 = inlined_call_operand.hbm [shape: f32[32,32], index: 3, kind: input, shape index: {}]   ;;  %s1066_s4 = inlined_call_operand.vmem [shape: f32[1,32], index: 4, kind: input, shape index: {}]   ;;  %s1067_s5 = inlined_call_operand.hbm [shape: f32[32,32], index: 5, kind: input, shape index: {}]   ;;  %s1068_s6 = inlined_call_operand.vmem [shape: f32[1,32], index: 6, kind: input, shape index: {}]   ;;  %s1069_s7 = inlined_call_operand.hbm [shape: f32[32,32], index: 7, kind: input, shape index: {}]   ;;  %s1070_s8 = inlined_call_operand.vmem [shape: f32[1,32], index: 8, kind: input, shape index: {}]   ;;  %s1071_s9 = inlined_call_operand.vmem [shape: f32[4,16,8], index: 9, kind: output, shape index: {0}]   ;;  %s1072_s10 = inlined_call_operand.vmem [shape: f32[4,16,8], index: 10, kind: output, shape index: {1}]   ;;  %s1073_s11 = inlined_call_operand.vmem [shape: f32[4,16,8], index: 11, kind: output, shape index: {2}]  }
   0x1   :  { %18 = vsyncpa [#allocation5], 0 }
   0x2   :  { %19 = vsyncpa [#allocation8], 0 }
   0x3   :  { %20 = vsyncpa [#allocation11], 0  ;;  %s763_s17 = smov [#allocation4]   ;;  %s764_s19 = smov [#allocation7]  }
   0x4   :  { %s38_s18 = sshll.u32 %s763_s17, 4  ;;  %s62_s20 = sshll.u32 %s764_s19, 4  ;;  %s39_s18 = int_to_ptr.vmem [resolvable:$true] %s38_s18  ;;  %s834_s20 = int_to_ptr.vmem [resolvable:$true] %s62_s20 }
   0x5   :  { %s623_s23 = scalar_lea.hbm %s1063_s1, 256 }
   0x6   :  { %p624_p0 = scmp.ne.s32.totalorder %s1063_s1, %s623_s23  ;;  %p627_p1 = scmp.lt.u32.totalorder %s623_s23, %s1063_s1 }
   0x8   :  { %p629_p2 = pnand %p627_p1, %p624_p0 }
   0xa   :  { %632 = shalt.err (!%p629_p2)
}
   0xb   :  { %s633_s28 = scalar_lea.vmem %s39_s18, 256  ;;  %p638_p4 = scmp.lt.s32.totalorder %s39_s18, %s39_s18 }
   0xc   :  { %p634_p3 = scmp.ne.s32.totalorder %s39_s18, %s633_s28  ;;  %p639_p5 = scmp.lt.s32.totalorder %s633_s28, %s633_s28 }
   0xe   :  { %p640_p6 = por %p639_p5, %p638_p4 }
  0x10   :  { %p641_p7 = pnand %p640_p6, %p634_p3 }
  0x12   :  { %644 = shalt.err (!%p641_p7)
}
  0x13   :  { %s765_s29 = smov 128   ;;  %s766_s30 = smov 8  }
  0x14   :  { %44 = dma.hbm_to_vmem [thread:$0]  %s1063_s1, 256, %s39_s18, [#allocation5], %s765_s29, %s765_s29, %s766_s30  }
  0x15   :  { %s645_s16 = scalar_lea.hbm %s1065_s3, 512 }
  0x16   :  { %p646_p8 = scmp.ne.s32.totalorder %s1065_s3, %s645_s16  ;;  %p649_p9 = scmp.lt.u32.totalorder %s645_s16, %s1065_s3 }
  0x18   :  { %p651_p10 = pnand %p649_p9, %p646_p8 }
  0x1a   :  { %654 = shalt.err (!%p651_p10)
}
  0x1b   :  { %s655_s23 = scalar_lea.vmem %s834_s20, 512  ;;  %p660_p12 = scmp.lt.s32.totalorder %s834_s20, %s834_s20 }
  0x1c   :  { %p656_p11 = scmp.ne.s32.totalorder %s834_s20, %s655_s23  ;;  %p661_p13 = scmp.lt.s32.totalorder %s655_s23, %s655_s23 }
  0x1e   :  { %p662_p0 = por %p661_p13, %p660_p12 }
  0x20   :  { %p663_p1 = pnand %p662_p0, %p656_p11 }
  0x22   :  { %666 = shalt.err (!%p663_p1)
}
  0x23   :  { %68 = dma.hbm_to_vmem [thread:$0]  %s1065_s3, 512, %s834_s20, [#allocation8], %s765_s29, %s765_s29, %s766_s30  }
  0x24   :  { %s767_s24 = smov [#allocation2]   ;;  %s768_s26 = smov [#allocation6]  }
  0x25   :  { %s26_s25 = sshll.u32 %s767_s24, 4  ;;  %s50_s27 = sshll.u32 %s768_s26, 4  ;;  %s27_s25 = int_to_ptr.vmem [resolvable:$true] %s26_s25  ;;  %s871_s27 = int_to_ptr.vmem [resolvable:$true] %s50_s27 }
  0x26   :  { %s667_s13 = scalar_lea.hbm %s1062_s0, 256 }
  0x27   :  { %p668_p2 = scmp.ne.s32.totalorder %s1062_s0, %s667_s13  ;;  %p671_p3 = scmp.lt.u32.totalorder %s667_s13, %s1062_s0 }
  0x29   :  { %p673_p4 = pnand %p671_p3, %p668_p2 }
  0x2b   :  { %676 = shalt.err (!%p673_p4)
}
  0x2c   :  { %s677_s3 = scalar_lea.vmem %s27_s25, 256  ;;  %p682_p6 = scmp.lt.s32.totalorder %s27_s25, %s27_s25 }
  0x2d   :  { %p678_p5 = scmp.ne.s32.totalorder %s27_s25, %s677_s3  ;;  %p683_p7 = scmp.lt.s32.totalorder %s677_s3, %s677_s3 }
  0x2f   :  { %p684_p8 = por %p683_p7, %p682_p6 }
  0x31   :  { %p685_p9 = pnand %p684_p8, %p678_p5 }
  0x33   :  { %688 = shalt.err (!%p685_p9)
}
  0x34   :  { %32 = dma.hbm_to_vmem [thread:$0]  %s1062_s0, 256, %s27_s25, [#allocation3], %s765_s29, %s765_s29, %s766_s30  }
  0x35   :  { %s689_s23 = scalar_lea.hbm %s1064_s2, 256 }
  0x36   :  { %p690_p10 = scmp.ne.s32.totalorder %s1064_s2, %s689_s23  ;;  %p693_p11 = scmp.lt.u32.totalorder %s689_s23, %s1064_s2 }
  0x38   :  { %p695_p12 = pnand %p693_p11, %p690_p10 }
  0x3a   :  { %698 = shalt.err (!%p695_p12)
}
  0x3b   :  { %s699_s28 = scalar_lea.vmem %s871_s27, 256  ;;  %p704_p0 = scmp.lt.s32.totalorder %s871_s27, %s871_s27 }
  0x3c   :  { %p700_p13 = scmp.ne.s32.totalorder %s871_s27, %s699_s28  ;;  %p705_p1 = scmp.lt.s32.totalorder %s699_s28, %s699_s28 }
  0x3e   :  { %p706_p2 = por %p705_p1, %p704_p0 }
  0x40   :  { %p707_p3 = pnand %p706_p2, %p700_p13 }
  0x42   :  { %710 = shalt.err (!%p707_p3)
}
  0x43   :  { %56 = dma.hbm_to_vmem [thread:$0]  %s1064_s2, 256, %s871_s27, [#allocation5], %s765_s29, %s765_s29, %s766_s30  }
  0x44   :  { %s769_s12 = smov [#allocation9]   ;;  %s770_s14 = smov [#allocation10]  }
  0x45   :  { %s76_s13 = sshll.u32 %s769_s12, 4  ;;  %s90_s15 = sshll.u32 %s770_s14, 4  ;;  %s77_s13 = int_to_ptr.vmem [resolvable:$true] %s76_s13  ;;  %s908_s15 = int_to_ptr.vmem [resolvable:$true] %s90_s15 }
  0x46   :  { %s711_s3 = scalar_lea.hbm %s1067_s5, 512 }
  0x47   :  { %p712_p4 = scmp.ne.s32.totalorder %s1067_s5, %s711_s3  ;;  %p715_p5 = scmp.lt.u32.totalorder %s711_s3, %s1067_s5 }
  0x49   :  { %p717_p6 = pnand %p715_p5, %p712_p4 }
  0x4b   :  { %720 = shalt.err (!%p717_p6)
}
  0x4c   :  { %s721_s2 = scalar_lea.vmem %s77_s13, 512  ;;  %p726_p8 = scmp.lt.s32.totalorder %s77_s13, %s77_s13 }
  0x4d   :  { %p722_p7 = scmp.ne.s32.totalorder %s77_s13, %s721_s2  ;;  %p727_p9 = scmp.lt.s32.totalorder %s721_s2, %s721_s2 }
  0x4f   :  { %p728_p10 = por %p727_p9, %p726_p8 }
  0x51   :  { %p729_p11 = pnand %p728_p10, %p722_p7 }
  0x53   :  { %732 = shalt.err (!%p729_p11)
}
  0x54   :  { %82 = dma.hbm_to_vmem [thread:$0]  %s1067_s5, 512, %s77_s13, [#allocation8], %s765_s29, %s765_s29, %s766_s30  }
  0x55   :  { %s733_s24 = scalar_lea.hbm %s1069_s7, 512 }
  0x56   :  { %p734_p12 = scmp.ne.s32.totalorder %s1069_s7, %s733_s24  ;;  %p737_p13 = scmp.lt.u32.totalorder %s733_s24, %s1069_s7 }
  0x58   :  { %p739_p0 = pnand %p737_p13, %p734_p12 }
  0x5a   :  { %742 = shalt.err (!%p739_p0)
}
  0x5b   :  { %s743_s12 = scalar_lea.vmem %s908_s15, 512  ;;  %p748_p2 = scmp.lt.s32.totalorder %s908_s15, %s908_s15 }
  0x5c   :  { %p744_p1 = scmp.ne.s32.totalorder %s908_s15, %s743_s12  ;;  %p749_p3 = scmp.lt.s32.totalorder %s743_s12, %s743_s12 }
  0x5e   :  { %p750_p4 = por %p749_p3, %p748_p2 }
  0x60   :  { %p751_p5 = pnand %p750_p4, %p744_p1 }
  0x62   :  { %754 = shalt.err (!%p751_p5)
}
  0x63   :  { %96 = dma.hbm_to_vmem [thread:$0]  %s1069_s7, 512, %s908_s15, [#allocation11], %s765_s29, %s765_s29, %s766_s30  }
  0x64   :  { %755 = dma.done.wait [#allocation3], 256  }
  0x65   :  { %756 = vsyncadd [#allocation3], 4294967040 }
  0x66   :  { %757 = dma.done.wait [#allocation5], 512  }
  0x67   :  { %758 = vsyncadd [#allocation5], 4294966784 }
  0x68   :  { %759 = dma.done.wait [#allocation8], 1024  }
  0x69   :  { %760 = vsyncadd [#allocation8], 4294966272 }
  0x6a   :  { %761 = dma.done.wait [#allocation11], 512  }
  0x6b   :  { %762 = vsyncadd [#allocation11], 4294966784  ;;  %vm130_vm0 = vcmask 261120   ;;  %v119_v0 = vld [vmem:[#allocation7] sm:$0xff]  ;;  %v120_v1 = vld [vmem:[#allocation7 + $0x8] sm:$0xff]  ;;  %vm212_vm1 = vcmask 64512  }
  0x6c   :  { %v121_v2 = vld [vmem:[#allocation7 + $0x10] sm:$0xff]  ;;  %v588_v3 = vpack.c.bf16 %v120_v1, %v119_v0  ;;  %v122_v4 = vld [vmem:[#allocation7 + $0x18] sm:$0xff]  ;;  %v246_v6 = vld [vmem:[#allocation9] sm:$0xff]  ;;  %s771_s17 = smov 112   ;;  %s772_s3 = smov 120  }
  0x6d   :  { %v117_v5 = vld [vmem:[#allocation2] sm:$0xff]  ;;  %v592_v7 = vpack.c.bf16 %v122_v4, %v121_v2  ;;  %v247_v8 = vld [vmem:[#allocation9 + $0x8] sm:$0xff]  ;;  %v249_v11 = vld [vmem:[#allocation9 + $0x18] sm:$0xff]  ;;  %s773_s23 = smov 104  }
  0x6e   :  { %563 = vmatprep.mubr.msk.f32.mxu0 %vm130_vm0, %v117_v5  ;;  %v248_v9 = vld [vmem:[#allocation9 + $0x10] sm:$0xff]  ;;  %589 = vmatprep.subr.bf16.mxu0 %v588_v3  ;;  %v596_v10 = vpack.c.bf16 %v247_v8, %v246_v6  ;;  %v244_v12 = vld [vmem:[#allocation4] sm:$0xff]  ;;  %v372_v15 = vld [vmem:[#allocation10 + $0x8] sm:$0xff] }
  0x6f   :  { %591 = vmatpush3.bf16.msra.mxu0 %v588_v3  ;;  %v600_v13 = vpack.c.bf16 %v249_v11, %v248_v9  ;;  %574 = vmatprep.mubr.msk.f32.mxu1 %vm130_vm0, %v244_v12  ;;  %v371_v14 = vld [vmem:[#allocation10] sm:$0xff]  ;;  %v373_v17 = vld [vmem:[#allocation10 + $0x10] sm:$0xff]  ;;  %v374_v18 = vld [vmem:[#allocation10 + $0x18] sm:$0xff] }
  0x70   :  { %593 = vmatprep.subr.bf16.mxu0 %v592_v7  ;;  %597 = vmatprep.subr.bf16.mxu1 %v596_v10  ;;  %v604_v16 = vpack.c.bf16 %v372_v15, %v371_v14  ;;  %v118_v19 = vld [vmem:[#allocation2 + $0x8] sm:$0xff]  ;;  %v608_v20 = vpack.c.bf16 %v374_v18, %v373_v17  ;;  %v369_v21 = vld [vmem:[#allocation6] sm:$0xff]  ;;  %v245_v22 = vld [vmem:[#allocation4 + $0x8] sm:$0xff] }
  0x71   :  { %599 = vmatpush3.bf16.msra.mxu1 %v596_v10  ;;  %v370_v23 = vld [vmem:[#allocation6 + $0x8] sm:$0xff]  ;;  %v510_v24 = vld [vmem:[%s1066_s4] ss:$0 sm:$0xff] }
  0x72   :  { %601 = vmatprep.subr.bf16.mxu1 %v600_v13  ;;  %v519_v26 = vld [vmem:[%s1068_s6] ss:$0 sm:$0xff] }
  0x73   :  { %595 = vmatpush3.bf16.msra.mxu0 %v592_v7  ;;  %v528_v34 = vld [vmem:[%s1070_s8] ss:$0 sm:$0xff] }
  0x74   :  { %605 = vmatprep.subr.bf16.mxu0 %v604_v16 }
  0x75   :  { %603 = vmatpush3.bf16.msra.mxu1 %v600_v13 }
  0x76   :  { %564 = vmatmul.mubr.msk.f32.vlgmr.msra.gmra.mrb[0].mxu0 %vm130_vm0, %v118_v19 }
  0x77   :  { %607 = vmatpush3.bf16.msra.mxu0 %v604_v16  ;;  %585 = vmatprep.mubr.msk.f32.mxu0 %vm130_vm0, %v369_v21 }
  0x78   :  { %575 = vmatmul.mubr.msk.f32.vlgmr.msra.gmra.mrb[0].mxu1 %vm130_vm0, %v245_v22  ;;  %609 = vmatprep.subr.bf16.mxu0 %v608_v20 }
  0x7b   :  { %611 = vmatpush3.bf16.msra.mxu0 %v608_v20 }
  0x7e   :  { %586 = vmatmul.mubr.msk.f32.vlgmr.msra.gmra.mrb[2].mxu0 %vm130_vm0, %v370_v23 }
 0x149   :  { %v565_v25 = vpop.f32.mrb[0].mxu0 }
 0x14a   :  { %v209_v27 = vadd.f32 %v565_v25, %v510_v24  ;;  %v203_v28 = vpop.f32.mrb[1].mxu0 }
 0x14b   :  { %v204_v29 = vadd.f32 %v510_v24, %v203_v28  ;;  %v576_v30 = vpop.f32.mrb[0].mxu1 }
 0x14c   :  { %214 = vst.msk [vmem:[%s1071_s9 + $0x8] sm:$0xff] %vm212_vm1, %v209_v27  ;;  %228 = vrot.lane.b32.xlu1 %v209_v27, %s771_s17  ;;  %219 = vrot.lane.b32.xlu0 %v209_v27, %s772_s3  ;;  %v335_v31 = vadd.f32 %v576_v30, %v519_v26  ;;  %v329_v32 = vpop.f32.mrb[1].mxu1 }
 0x14d   :  { %213 = vst.msk [vmem:[%s1071_s9] sm:$0xff] %vm212_vm1, %v204_v29  ;;  %v330_v33 = vadd.f32 %v519_v26, %v329_v32 }
 0x14e   :  { %339 = vst.msk [vmem:[%s1072_s10 + $0x8] sm:$0xff] %vm212_vm1, %v335_v31 }
 0x14f   :  { %338 = vst.msk [vmem:[%s1072_s10] sm:$0xff] %vm212_vm1, %v330_v33 }
 0x150   :  { %237 = vrot.lane.b32.xlu1 %v209_v27, %s773_s23  ;;  %217 = vrot.lane.b32.xlu0 %v204_v29, %s772_s3 }
 0x151   :  { %v587_v35 = vpop.f32.mrb[2].mxu0 }
 0x152   :  { %v460_v36 = vadd.f32 %v587_v35, %v528_v34  ;;  %v454_v37 = vpop.f32.mrb[3].mxu0 }
 0x153   :  { %v455_v38 = vadd.f32 %v528_v34, %v454_v37 }
 0x154   :  { %344 = vrot.lane.b32.xlu1 %v335_v31, %s772_s3  ;;  %235 = vrot.lane.b32.xlu0 %v204_v29, %s773_s23  ;;  %464 = vst.msk [vmem:[%s1073_s11 + $0x8] sm:$0xff] %vm212_vm1, %v460_v36 }
 0x155   :  { %463 = vst.msk [vmem:[%s1073_s11] sm:$0xff] %vm212_vm1, %v455_v38 }
 0x158   :  { %353 = vrot.lane.b32.xlu1 %v335_v31, %s771_s17  ;;  %342 = vrot.lane.b32.xlu0 %v330_v33, %s772_s3 }
 0x15c   :  { %362 = vrot.lane.b32.xlu1 %v335_v31, %s773_s23  ;;  %351 = vrot.lane.b32.xlu0 %v330_v33, %s771_s17 }
 0x160   :  { %226 = vrot.lane.b32.xlu1 %v204_v29, %s771_s17  ;;  %360 = vrot.lane.b32.xlu0 %v330_v33, %s773_s23 }
 0x164   :  { %469 = vrot.lane.b32.xlu1 %v460_v36, %s772_s3  ;;  %467 = vrot.lane.b32.xlu0 %v455_v38, %s772_s3 }
 0x168   :  { %478 = vrot.lane.b32.xlu1 %v460_v36, %s771_s17  ;;  %476 = vrot.lane.b32.xlu0 %v455_v38, %s771_s17 }
 0x16c   :  { %487 = vrot.lane.b32.xlu1 %v460_v36, %s773_s23  ;;  %485 = vrot.lane.b32.xlu0 %v455_v38, %s773_s23 }
 0x1be   :  { %v229_v39 = vpop.permute.xlu1 %228  ;;  %v220_v40 = vpop.permute.xlu0 %219 }
 0x1bf   :  { %516 = vst.msk [vmem:[%s1071_s9 + $0x28] sm:$0xff] %vm212_vm1, %v229_v39  ;;  %514 = vst.msk [vmem:[%s1071_s9 + $0x18] sm:$0xff] %vm212_vm1, %v220_v40 }
 0x1c2   :  { %v238_v41 = vpop.permute.xlu1 %237  ;;  %v218_v42 = vpop.permute.xlu0 %217 }
 0x1c3   :  { %518 = vst.msk [vmem:[%s1071_s9 + $0x38] sm:$0xff] %vm212_vm1, %v238_v41  ;;  %513 = vst.msk [vmem:[%s1071_s9 + $0x10] sm:$0xff] %vm212_vm1, %v218_v42 }
 0x1c6   :  { %v345_v43 = vpop.permute.xlu1 %344  ;;  %v236_v44 = vpop.permute.xlu0 %235 }
 0x1c7   :  { %523 = vst.msk [vmem:[%s1072_s10 + $0x18] sm:$0xff] %vm212_vm1, %v345_v43  ;;  %517 = vst.msk [vmem:[%s1071_s9 + $0x30] sm:$0xff] %vm212_vm1, %v236_v44 }
 0x1ca   :  { %v354_v45 = vpop.permute.xlu1 %353  ;;  %v343_v46 = vpop.permute.xlu0 %342 }
 0x1cb   :  { %525 = vst.msk [vmem:[%s1072_s10 + $0x28] sm:$0xff] %vm212_vm1, %v354_v45  ;;  %522 = vst.msk [vmem:[%s1072_s10 + $0x10] sm:$0xff] %vm212_vm1, %v343_v46 }
 0x1ce   :  { %v363_v47 = vpop.permute.xlu1 %362  ;;  %v352_v48 = vpop.permute.xlu0 %351 }
 0x1cf   :  { %527 = vst.msk [vmem:[%s1072_s10 + $0x38] sm:$0xff] %vm212_vm1, %v363_v47  ;;  %524 = vst.msk [vmem:[%s1072_s10 + $0x20] sm:$0xff] %vm212_vm1, %v352_v48 }
 0x1d2   :  { %v227_v49 = vpop.permute.xlu1 %226  ;;  %v361_v50 = vpop.permute.xlu0 %360 }
 0x1d3   :  { %515 = vst.msk [vmem:[%s1071_s9 + $0x20] sm:$0xff] %vm212_vm1, %v227_v49  ;;  %526 = vst.msk [vmem:[%s1072_s10 + $0x30] sm:$0xff] %vm212_vm1, %v361_v50 }
 0x1d6   :  { %v470_v51 = vpop.permute.xlu1 %469  ;;  %v468_v52 = vpop.permute.xlu0 %467 }
 0x1d7   :  { %532 = vst.msk [vmem:[%s1073_s11 + $0x18] sm:$0xff] %vm212_vm1, %v470_v51  ;;  %531 = vst.msk [vmem:[%s1073_s11 + $0x10] sm:$0xff] %vm212_vm1, %v468_v52 }
 0x1da   :  { %v479_v53 = vpop.permute.xlu1 %478  ;;  %v477_v54 = vpop.permute.xlu0 %476 }
 0x1db   :  { %534 = vst.msk [vmem:[%s1073_s11 + $0x28] sm:$0xff] %vm212_vm1, %v479_v53  ;;  %533 = vst.msk [vmem:[%s1073_s11 + $0x20] sm:$0xff] %vm212_vm1, %v477_v54 }
 0x1de   :  { %v488_v55 = vpop.permute.xlu1 %487  ;;  %v486_v56 = vpop.permute.xlu0 %485 }
 0x1df   :  { %536 = vst.msk [vmem:[%s1073_s11 + $0x38] sm:$0xff] %vm212_vm1, %v488_v55  ;;  %535 = vst.msk [vmem:[%s1073_s11 + $0x30] sm:$0xff] %vm212_vm1, %v486_v56 }
 0x1e0   :  { %506 = vsyncpa [#allocation3], 1 }
 0x1e1   :  { %507 = vsyncpa [#allocation5], 1 }
 0x1e2   :  { %508 = vsyncpa [#allocation8], 1 }
 0x1e3   :  { %509 = vsyncpa [#allocation11], 1 }

</bundles_post_ra>
